<compile_context>
chip_gen: v5e
topology: v5e:2x2
jax: 0.10.0
libtpu: 0.0.40
codegen_flags: <defaults>
</compile_context>

<pallas_src>
import functools
import math

import jax
import jax.numpy as jnp
from jax import lax
from jax.experimental import pallas as pl
from jax.experimental.pallas import tpu as pltpu


def _round_up(x, m):
    return ((x + m - 1) // m) * m


def _conv_tile_kernel(x_ref, w_ref, b_ref, o_ref, *, k, stride, h_tile, wout_p):
    """One (batch, row-band) tile.

    x_ref: (h_block, wp_e, cin)  halo window of the reflect-padded NHWC input
    w_ref: (cout_p, k*k*cin)     all taps folded into the contraction dim
    b_ref: (cout_p, 1)           f32 bias column
    o_ref: (cout_p, m_tile)      lane-dense, NCHW-ordered output row band
    """
    cin = x_ref.shape[-1]
    m_tile = h_tile * wout_p

    # Fused im2col: K*K shifted windows, each reshaped (layout-trivially, since
    # wout_p % 8 == 0) to (m_tile, cin), stacked along lanes -> (m_tile, K*K*cin).
    pieces = []
    for kh in range(k):
        for kw in range(k):
            if stride == 1:
                win = x_ref[kh:kh + h_tile, kw:kw + wout_p, :]
            else:
                # TODO(synk): if strided pl.ds on the sublane (W) dim fails to
                # lower for a packed dtype, fall back to stride-1 + subsample.
                win = x_ref[pl.ds(kh, h_tile, stride),
                            pl.ds(kw, wout_p, stride), :]
            pieces.append(win.reshape(m_tile, cin))
    patches = jnp.concatenate(pieces, axis=-1)            # (m_tile, k*k*cin)

    # Single MXU contraction over K*K*Cin.  Both operands contract their minor
    # axis, so only the tiny weight is re-laid-out; f32 accumulation, bounded
    # (cout_p, m_tile) result, no per-tap accumulator round-trips.
    acc = lax.dot_general(
        w_ref[...], patches,
        dimension_numbers=(((1,), (1,)), ((), ())),
        preferred_element_type=jnp.float32)                # (cout_p, m_tile)

    o_ref[...] = (acc + b_ref[...]).astype(o_ref.dtype)


def _pick_h_tile(hout, wout_p, h_tile, target_m=2048):
    """Pick an output-row tile: divides hout, h_tile*wout_p % 128 == 0 (or T==1)."""
    if h_tile is not None:
        if h_tile < 1 or hout % h_tile != 0:
            raise ValueError(f"h_tile={h_tile} must divide hout={hout}")
        if h_tile != hout and (h_tile * wout_p) % 128 != 0:
            raise ValueError("h_tile*wout_p must be a multiple of 128 when tiling")
        return h_tile
    best = hout
    for d in range(1, hout + 1):
        if hout % d == 0 and (d * wout_p) % 128 == 0 and d * wout_p <= target_m:
            best = d
    return best


@functools.partial(jax.jit,
                   static_argnames=("kernel_size", "stride", "compute_dtype",
                                    "h_tile"))
def conv_layer_forward(x_nchw, weight, bias, *, kernel_size, stride,
                       compute_dtype=None, h_tile=None):
    """ConvLayer.forward: Conv2d(in, out, k, stride, padding=k//2, reflect).

    x_nchw : (N, Cin, H, W)   weight : (Cout, Cin, K, K)   bias : (Cout,)
    returns: (N, Cout, Hout, Wout)
    """
    n, cin, h, w = x_nchw.shape
    cout, cin_w, k, k2 = weight.shape
    assert k == kernel_size and k2 == kernel_size and cin_w == cin

    pad = kernel_size // 2
    if pad > 0 and (h <= pad or w <= pad):
        raise ValueError("reflect padding requires spatial dims > kernel_size // 2")

    out_dtype = x_nchw.dtype
    cdt = out_dtype if compute_dtype is None else jnp.dtype(compute_dtype)

    hp, wp = h + 2 * pad, w + 2 * pad
    hout = (hp - k) // stride + 1
    wout = (wp - k) // stride + 1

    # Layout sizing (review item 11): wout padded to a multiple of 8 keeps the
    # window reshape trivial; m_tile a multiple of 128 -> unmasked vst.
    wout_p = _round_up(wout, 8)
    h_tile_ = _pick_h_tile(hout, wout_p, h_tile)
    n_htiles = hout // h_tile_
    m_tile = h_tile_ * wout_p
    h_block = (h_tile_ - 1) * stride + k                 # rows needed per band
    wp_e = max(wp, (wout_p - 1) * stride + k)            # zero cols for wout pad
    cout_p = _round_up(cout, 8)                          # sublane-align MXU M dim
    kkc = k * k * cin

    # --- pre-pass (one fused XLA op): reflect pad + NHWC + cast + halo bands.
    x_nhwc = jnp.transpose(x_nchw, (0, 2, 3, 1))
    xp = jnp.pad(x_nhwc, ((0, 0), (pad, pad), (pad, pad), (0, 0)), mode="reflect")
    if wp_e > wp:
        xp = jnp.pad(xp, ((0, 0), (0, 0), (0, wp_e - wp), (0, 0)))
    xp = xp.astype(cdt)
    wins = jnp.stack(
        [lax.slice_in_dim(xp, j * h_tile_ * stride,
                          j * h_tile_ * stride + h_block, axis=1)
         for j in range(n_htiles)], axis=1)              # (n, T, h_block, wp_e, cin)

    # Weights: (Cout, Cin, K, K) -> (cout_p, K*K*Cin); taps on the contraction.
    w2 = jnp.transpose(weight, (0, 2, 3, 1)).reshape(cout, kkc)
    w2 = jnp.pad(w2, ((0, cout_p - cout), (0, 0))).astype(cdt)
    b_col = jnp.pad(bias, (0, cout_p - cout)).reshape(cout_p, 1).astype(jnp.float32)

    kernel = functools.partial(_conv_tile_kernel, k=k, stride=stride,
                               h_tile=h_tile_, wout_p=wout_p)

    in_isz = jnp.dtype(cdt).itemsize
    out_isz = jnp.dtype(out_dtype).itemsize

    # Per-generation scoped-VMEM defaults are far below physical: size the limit
    # from the real (lane/sublane-padded) block footprint (review items 5/6).
    def _blk_bytes(shape, itemsize):
        s = list(shape)
        s[-1] = _round_up(s[-1], 128)
        if len(s) >= 2:
            s[-2] = _round_up(s[-2], 8)
        return int(math.prod(s)) * itemsize

    est = (2 * _blk_bytes((h_block, wp_e, cin), in_isz)      # double-buffered input
           + 2 * _blk_bytes((cout_p, m_tile), out_isz)       # double-buffered output
           + _blk_bytes((cout_p, kkc), in_isz)
           + _blk_bytes((cout_p, 1), 4)
           + 2 * _blk_bytes((m_tile, kkc), in_isz)           # staged patches
           + _blk_bytes((cout_p, m_tile), 4))                # f32 accumulator
    vmem_limit = int(min(max(2 * est + (8 << 20), 32 << 20), 64 << 20))

    cost = pl.CostEstimate(
        flops=2 * n * n_htiles * m_tile * kkc * cout_p,
        transcendentals=0,
        bytes_accessed=(wins.size * in_isz + w2.size * in_isz + b_col.size * 4
                        + n * cout_p * hout * wout_p * out_isz),
    )

    out = pl.pallas_call(
        kernel,
        out_shape=jax.ShapeDtypeStruct((n, cout_p, hout * wout_p), out_dtype),
        grid_spec=pltpu.PrefetchScalarGridSpec(
            num_scalar_prefetch=0,
            grid=(n, n_htiles),
            in_specs=[
                pl.BlockSpec((None, None, h_block, wp_e, cin),
                             lambda i, j: (i, j, 0, 0, 0)),
                pl.BlockSpec((cout_p, kkc), lambda i, j: (0, 0)),
                pl.BlockSpec((cout_p, 1), lambda i, j: (0, 0)),
            ],
            out_specs=pl.BlockSpec((None, cout_p, m_tile), lambda i, j: (i, 0, j)),
        ),
        compiler_params=pltpu.CompilerParams(
            dimension_semantics=("parallel", "parallel"),
            vmem_limit_bytes=vmem_limit),
        cost_estimate=cost,
    )(wins, w2, b_col)

    # (N, cout_p, hout*wout_p) -> NCHW; reshape is free, pad rows/cols dropped.
    out = out.reshape(n, cout_p, hout, wout_p)
    return out[:, :cout, :, :wout]


if __name__ == "__main__":
    # Small shapes consistent with the module.
    N, Cin, H, W = 2, 4, 16, 16
    Cout, K, STRIDE = 8, 3, 1

    key = jax.random.PRNGKey(0)
    kx, kw_, kb = jax.random.split(key, 3)
    x = jax.random.normal(kx, (N, Cin, H, W), dtype=jnp.float32)
    # Deterministic init mimicking Conv2d default (uniform in +/- 1/sqrt(fan_in)).
    fan_in = Cin * K * K
    bound = 1.0 / (fan_in ** 0.5)
    weight = jax.random.uniform(kw_, (Cout, Cin, K, K), jnp.float32,
                                minval=-bound, maxval=bound)
    bias = jax.random.uniform(kb, (Cout,), jnp.float32,
                              minval=-bound, maxval=bound)

    # h_tile=8 -> grid (2, 2): exercises spatial tiling + 4 parallel steps.
    out = conv_layer_forward(x, weight, bias, kernel_size=K, stride=STRIDE,
                             h_tile=8)
    out = jax.block_until_ready(out)

    # Reference check against XLA conv on the reflect-padded input.
    pad = K // 2
    x_pad = jnp.pad(x, ((0, 0), (0, 0), (pad, pad), (pad, pad)), mode="reflect")
    ref = lax.conv_general_dilated(
        x_pad, weight, window_strides=(STRIDE, STRIDE), padding="VALID",
        dimension_numbers=("NCHW", "OIHW", "NCHW"),
    ) + bias.reshape(1, Cout, 1, 1)

    assert out.shape == ref.shape, (out.shape, ref.shape)
    assert jnp.allclose(out, ref, atol=1e-4, rtol=1e-4)
    print("KERNEL_OK")
</pallas_src>

<mosaic_0001>
module attributes {stable_mosaic.version = 11 : i64} {
  func.func @_conv_tile_kernel(%arg0: i32, %arg1: i32, %arg2: memref<1x1x10x18x4xf32, #tpu.memory_space<vmem>>, %arg3: memref<8x36xf32, #tpu.memory_space<vmem>>, %arg4: memref<8x1xf32, #tpu.memory_space<vmem>>, %arg5: memref<1x8x128xf32, #tpu.memory_space<vmem>>) attributes {dimension_semantics = [#tpu.dimension_semantics<parallel>, #tpu.dimension_semantics<parallel>], iteration_bounds = array<i64: 2, 2>, scalar_prefetch = 0 : i64, scratch_operands = 0 : i64, tpu.core_type = #tpu.core_type<tc>, window_params = [{transform_indices = @transform_0, window_bounds = array<i64: 1, 1, 10, 18, 4>}, {pipeline_mode = #tpu.pipeline_mode<synchronous>, transform_indices = @transform_1, window_bounds = array<i64: 8, 36>}, {pipeline_mode = #tpu.pipeline_mode<synchronous>, transform_indices = @transform_2, window_bounds = array<i64: 8, 1>}, {transform_indices = @transform_3, window_bounds = array<i64: 1, 8, 128>}]} {
    %c0 = arith.constant 0 : index
    %c0_0 = arith.constant 0 : index
    %c0_1 = arith.constant 0 : index
    %c0_2 = arith.constant 0 : index
    %c0_3 = arith.constant 0 : index
    %0 = vector.load %arg2[%c0, %c0_0, %c0_1, %c0_2, %c0_3] : memref<1x1x10x18x4xf32, #tpu.memory_space<vmem>>, vector<1x1x8x16x4xf32>
    %1 = vector.shape_cast %0 : vector<1x1x8x16x4xf32> to vector<8x16x4xf32>
    %2 = vector.shape_cast %1 : vector<8x16x4xf32> to vector<128x4xf32>
    %c0_4 = arith.constant 0 : index
    %c0_5 = arith.constant 0 : index
    %c0_6 = arith.constant 0 : index
    %c1 = arith.constant 1 : index
    %c0_7 = arith.constant 0 : index
    %3 = vector.load %arg2[%c0_4, %c0_5, %c0_6, %c1, %c0_7] : memref<1x1x10x18x4xf32, #tpu.memory_space<vmem>>, vector<1x1x8x16x4xf32>
    %4 = vector.shape_cast %3 : vector<1x1x8x16x4xf32> to vector<8x16x4xf32>
    %5 = vector.shape_cast %4 : vector<8x16x4xf32> to vector<128x4xf32>
    %c0_8 = arith.constant 0 : index
    %c0_9 = arith.constant 0 : index
    %c0_10 = arith.constant 0 : index
    %c2 = arith.constant 2 : index
    %c0_11 = arith.constant 0 : index
    %6 = vector.load %arg2[%c0_8, %c0_9, %c0_10, %c2, %c0_11] : memref<1x1x10x18x4xf32, #tpu.memory_space<vmem>>, vector<1x1x8x16x4xf32>
    %7 = vector.shape_cast %6 : vector<1x1x8x16x4xf32> to vector<8x16x4xf32>
    %8 = vector.shape_cast %7 : vector<8x16x4xf32> to vector<128x4xf32>
    %c0_12 = arith.constant 0 : index
    %c0_13 = arith.constant 0 : index
    %c1_14 = arith.constant 1 : index
    %c0_15 = arith.constant 0 : index
    %c0_16 = arith.constant 0 : index
    %9 = vector.load %arg2[%c0_12, %c0_13, %c1_14, %c0_15, %c0_16] : memref<1x1x10x18x4xf32, #tpu.memory_space<vmem>>, vector<1x1x8x16x4xf32>
    %10 = vector.shape_cast %9 : vector<1x1x8x16x4xf32> to vector<8x16x4xf32>
    %11 = vector.shape_cast %10 : vector<8x16x4xf32> to vector<128x4xf32>
    %c0_17 = arith.constant 0 : index
    %c0_18 = arith.constant 0 : index
    %c1_19 = arith.constant 1 : index
    %c1_20 = arith.constant 1 : index
    %c0_21 = arith.constant 0 : index
    %12 = vector.load %arg2[%c0_17, %c0_18, %c1_19, %c1_20, %c0_21] : memref<1x1x10x18x4xf32, #tpu.memory_space<vmem>>, vector<1x1x8x16x4xf32>
    %13 = vector.shape_cast %12 : vector<1x1x8x16x4xf32> to vector<8x16x4xf32>
    %14 = vector.shape_cast %13 : vector<8x16x4xf32> to vector<128x4xf32>
    %c0_22 = arith.constant 0 : index
    %c0_23 = arith.constant 0 : index
    %c1_24 = arith.constant 1 : index
    %c2_25 = arith.constant 2 : index
    %c0_26 = arith.constant 0 : index
    %15 = vector.load %arg2[%c0_22, %c0_23, %c1_24, %c2_25, %c0_26] : memref<1x1x10x18x4xf32, #tpu.memory_space<vmem>>, vector<1x1x8x16x4xf32>
    %16 = vector.shape_cast %15 : vector<1x1x8x16x4xf32> to vector<8x16x4xf32>
    %17 = vector.shape_cast %16 : vector<8x16x4xf32> to vector<128x4xf32>
    %c0_27 = arith.constant 0 : index
    %c0_28 = arith.constant 0 : index
    %c2_29 = arith.constant 2 : index
    %c0_30 = arith.constant 0 : index
    %c0_31 = arith.constant 0 : index
    %18 = vector.load %arg2[%c0_27, %c0_28, %c2_29, %c0_30, %c0_31] : memref<1x1x10x18x4xf32, #tpu.memory_space<vmem>>, vector<1x1x8x16x4xf32>
    %19 = vector.shape_cast %18 : vector<1x1x8x16x4xf32> to vector<8x16x4xf32>
    %20 = vector.shape_cast %19 : vector<8x16x4xf32> to vector<128x4xf32>
    %c0_32 = arith.constant 0 : index
    %c0_33 = arith.constant 0 : index
    %c2_34 = arith.constant 2 : index
    %c1_35 = arith.constant 1 : index
    %c0_36 = arith.constant 0 : index
    %21 = vector.load %arg2[%c0_32, %c0_33, %c2_34, %c1_35, %c0_36] : memref<1x1x10x18x4xf32, #tpu.memory_space<vmem>>, vector<1x1x8x16x4xf32>
    %22 = vector.shape_cast %21 : vector<1x1x8x16x4xf32> to vector<8x16x4xf32>
    %23 = vector.shape_cast %22 : vector<8x16x4xf32> to vector<128x4xf32>
    %c0_37 = arith.constant 0 : index
    %c0_38 = arith.constant 0 : index
    %c2_39 = arith.constant 2 : index
    %c2_40 = arith.constant 2 : index
    %c0_41 = arith.constant 0 : index
    %24 = vector.load %arg2[%c0_37, %c0_38, %c2_39, %c2_40, %c0_41] : memref<1x1x10x18x4xf32, #tpu.memory_space<vmem>>, vector<1x1x8x16x4xf32>
    %25 = vector.shape_cast %24 : vector<1x1x8x16x4xf32> to vector<8x16x4xf32>
    %26 = vector.shape_cast %25 : vector<8x16x4xf32> to vector<128x4xf32>
    %27 = tpu.concatenate %2, %5, %8, %11, %14, %17, %20, %23, %26 in 1 : vector<128x4xf32>, vector<128x4xf32>, vector<128x4xf32>, vector<128x4xf32>, vector<128x4xf32>, vector<128x4xf32>, vector<128x4xf32>, vector<128x4xf32>, vector<128x4xf32> -> vector<128x36xf32>
    %c0_42 = arith.constant 0 : index
    %c0_43 = arith.constant 0 : index
    %28 = vector.load %arg3[%c0_42, %c0_43] : memref<8x36xf32, #tpu.memory_space<vmem>>, vector<8x36xf32>
    %cst = arith.constant dense<0.000000e+00> : vector<8x128xf32>
    %29 = tpu.matmul %28, %27, %cst {dimension_numbers = #tpu.dot_dimension_numbers<[1], [1], [0], [0], [0, 0, 1, 0], [], []>} : vector<8x36xf32>, vector<128x36xf32>, vector<8x128xf32> -> vector<8x128xf32>
    %c0_44 = arith.constant 0 : index
    %c0_45 = arith.constant 0 : index
    %30 = vector.load %arg4[%c0_44, %c0_45] : memref<8x1xf32, #tpu.memory_space<vmem>>, vector<8x1xf32>
    %31 = vector.broadcast %30 : vector<8x1xf32> to vector<8x128xf32>
    %32 = arith.addf %29, %31 : vector<8x128xf32>
    %c0_46 = arith.constant 0 : index
    %c0_47 = arith.constant 0 : index
    %c0_48 = arith.constant 0 : index
    %33 = vector.load %arg5[%c0_46, %c0_47, %c0_48] : memref<1x8x128xf32, #tpu.memory_space<vmem>>, vector<1x8x128xf32>
    %34 = vector.shape_cast %33 : vector<1x8x128xf32> to vector<8x128xf32>
    %35 = vector.shape_cast %32 : vector<8x128xf32> to vector<1x8x128xf32>
    tpu.vector_store %arg5[%c0_46, %c0_47, %c0_48], %35 {strides = array<i32>} : memref<1x8x128xf32, #tpu.memory_space<vmem>>, vector<1x8x128xf32>,
    return
  }
  func.func @transform_0(%arg0: i32, %arg1: i32) -> (i32, i32, i32, i32, i32) {
    %c0_i32 = arith.constant 0 : i32
    %c0_i32_0 = arith.constant 0 : i32
    %c0_i32_1 = arith.constant 0 : i32
    %c0_i32_2 = arith.constant 0 : i32
    return %arg0, %arg1, %c0_i32, %c0_i32_0, %c0_i32_1 : i32, i32, i32, i32, i32
  }
  func.func @transform_1(%arg0: i32, %arg1: i32) -> (i32, i32) {
    %c0_i32 = arith.constant 0 : i32
    %c0_i32_0 = arith.constant 0 : i32
    %c0_i32_1 = arith.constant 0 : i32
    return %c0_i32, %c0_i32_0 : i32, i32
  }
  func.func @transform_2(%arg0: i32, %arg1: i32) -> (i32, i32) {
    %c0_i32 = arith.constant 0 : i32
    %c0_i32_0 = arith.constant 0 : i32
    %c0_i32_1 = arith.constant 0 : i32
    return %c0_i32, %c0_i32_0 : i32, i32
  }
  func.func @transform_3(%arg0: i32, %arg1: i32) -> (i32, i32, i32) {
    %c0_i32 = arith.constant 0 : i32
    %c0_i32_0 = arith.constant 0 : i32
    return %arg0, %c0_i32, %arg1 : i32, i32, i32
  }
}

</mosaic_0001>

<bundles_post_ra>
// kernel: conv_layer_forward.1
= control target key start
LH: loop header
LB: loop body
LE: loop exit
PB: predicated region body
PF: predicated region fallthrough
CT: control target
= control target key end

     0   :  { %s1413_s12 = smov 0   ;;  %s1415_s13 = smov 0   ;;  %s2106_s0 = inlined_call_operand.vmem [shape: f32[2,2,10,18,4], index: 0, kind: input, shape index: {}]   ;;  %s2107_s1 = inlined_call_operand.vmem [shape: f32[8,36], index: 1, kind: input, shape index: {}]   ;;  %s2108_s2 = inlined_call_operand.vmem [shape: f32[8,1], index: 2, kind: input, shape index: {}]   ;;  %s2109_s3 = inlined_call_operand.vmem [shape: f32[2,8,256], index: 3, kind: output, shape index: {}]  }
   0x1   :  { %s1417_s14 = smov 0   ;;  %s1419_s15 = smov 0  }
   0x2   :  { %s1421_s16 = smov 0  }
   0x3 LB: > { %s22_s17 = sadd.s32 1, %s1374_s14  ;;  %s25_s18 = sadd.s32 1, %s1378_s15  ;;  %s1382_s16 = sphi %s1421_s16, %s13_s16   ;;  %s1378_s15 = sphi %s1419_s15, %s2132_s15   ;;  %s1374_s14 = sphi %s1417_s14, %s2131_s14   ;;  %s1370_s13 = sphi %s1415_s13, %s2130_s13   ;;  %s1366_s12 = sphi %s1413_s12, %s2129_s12  }
   0x4   : > { %p23_p0 = scmp.ge.s32.totalorder %s22_s17, 2  ;;  %p1172_p1 = scmp.ge.s32.totalorder %s1382_s16, 1 }
   0x5   : > { %p157_p2 = scmp.lt.s32.totalorder %s1382_s16, 5 }
   0x6   : > { %s2134_s17 = smov (%p23_p0, %s22_s17), 0  ;;  %s2136_s18 = smov (!%p23_p0, %s25_s18), %s1378_s15 }
   0x7   : > { %p158_p3 = pnand %p1172_p1, %p157_p2  ;;  %p27_p4 = scmp.ge.s32.totalorder %s2136_s18, 2 }
   0x9   : > { %s2138_s18 = smov (%p27_p4, %s2136_s18), 0  ;;  %161 = sbr.rel (%p158_p3) target bundleno = 610 (0x262), region = 32 }
   0xe   : > { %p188_p5 = scmp.lt.s32.totalorder %s1370_s13, 1  ;;  %p190_p6 = scmp.lt.s32.totalorder %s1366_s12, 1  ;;  %vm863_vm0 = vcmask 31744   ;;  %vm880_vm1 = vcmask 64512   ;;  %vm897_vm2 = vcmask 97280   ;;  %vm914_vm3 = vcmask 130048  }
   0xf   : > { %s1384_s26 = smov 4   ;;  %s1385_s27 = smov 8   ;;  %vm931_vm4 = vcmask 162816   ;;  %vm948_vm5 = vcmask 195584   ;;  %vm965_vm6 = vcmask 228352   ;;  %vm982_vm7 = vcmask 261120  }
  0x10   : > { %s2140_s13 = smov (!%p188_p5, %s1370_s13), 1  ;;  %s2142_s12 = smov (!%p190_p6, %s1366_s12), 1  ;;  %vm1006_vm8 = vcmask 293888  }
  0x11   : > { %s1292_s19 = smul.u32 60, %s2140_s13  ;;  %s1386_s28 = smov 12  }
  0x12   : > { %s1291_s20 = smul.u32 30, %s2142_s12  ;;  %s1387_s29 = smov 16  }
  0x13   : > { %s1388_s30 = smov 20   ;;  %s1389_s4 = smov 28  }
  0x14   : > { %s194_s21 = sadd.s32 %s1292_s19, %s1291_s20  ;;  %s1390_s5 = smov 24  }
  0x15   : > { %s1173_s22 = sshll.u32 %s194_s21, 3  ;;  %s1391_s6 = smov 32  }
  0x16   : > { %s1452_s25 = scalar_lea.vmem %s2106_s0, %s1173_s22  ;;  %s1174_s11 = sshll.u32 %s2140_s13, 1 }
  0x17   : > { %v1455_v0 = vld [vmem:[%s1452_s25 + $0x31] sm:$0xff]  ;;  %v1458_v1 = vld [vmem:[%s1452_s25 + $0x19] sm:$0xff]  ;;  %v221_v2 = vld [vmem:[%s1452_s25 + $0x1] sm:$0xff]  ;;  %s202_s19 = sadd.s32 %s1174_s11, %s2142_s12 }
  0x18   : > { %2117 = vst [vmem:[#allocation2_spill] sm:$0xff] %v1455_v0  ;;  %375 = vrot.lane.b32.xlu2 %v1455_v0, %s1384_s26  ;;  %371 = vrot.lane.b32.xlu1 %v1458_v1, %s1384_s26  ;;  %v1467_v3 = vld [vmem:[%s1452_s25 + $0x39] sm:$0xff]  ;;  %v1470_v4 = vld [vmem:[%s1452_s25 + $0x21] sm:$0xff]  ;;  %s1175_s20 = sshll.u32 %s202_s19, 3 }
  0x19   : > { %367 = vrot.lane.b32.xlu0 %v221_v2, %s1384_s26  ;;  %2118 = vst [vmem:[#allocation3_spill] sm:$0xff] %v1467_v3  ;;  %v222_v5 = vld [vmem:[%s1452_s25 + $0x9] sm:$0xff]  ;;  %v1479_v6 = vld [vmem:[%s1452_s25 + $0x61] sm:$0xff]  ;;  %v1482_v7 = vld [vmem:[%s1452_s25 + $0x51] sm:$0xff]  ;;  %s204_s23 = scalar_lea.vmem %s2109_s3, %s1175_s20 }
  0x1a   : > { %v1485_v8 = vld [vmem:[%s1452_s25 + $0x49] sm:$0xff]  ;;  %v1494_v9 = vld [vmem:[%s1452_s25 + $0x81] sm:$0xff]  ;;  %v1497_v10 = vld [vmem:[%s1452_s25 + $0x79] sm:$0xff] }
  0x1b   : > { %v1500_v11 = vld [vmem:[%s1452_s25 + $0x69] sm:$0xff]  ;;  %v1512_v13 = vld [vmem:[%s1452_s25 + $0x99] sm:$0xff]  ;;  %v1515_v14 = vld [vmem:[%s1452_s25 + $0x91] sm:$0xff] }
  0x1c   : > { %v1509_v12 = vld [vmem:[%s1452_s25 + $0xa9] sm:$0xff]  ;;  %v1526_v17 = vld [vmem:[%s1452_s25 + $0xb1] sm:$0xff]  ;;  %v1539_v20 = vld [vmem:[%s1452_s25 + $0x1a] sm:$0xff] }
  0x1d   : > { %v238_v15 = vld [vmem:[%s1452_s25 + $0xa] sm:$0xff]  ;;  %v237_v16 = vld [vmem:[%s1452_s25 + $0x2] sm:$0xff]  ;;  %v1533_v18 = vld [vmem:[%s1452_s25 + $0x32] sm:$0xff]  ;;  %2121 = vst [vmem:[#allocation6_spill] sm:$0xff] %v1539_v20 }
  0x1e   : > { %2119 = vst [vmem:[#allocation4_spill] sm:$0xff] %v1533_v18  ;;  %v1536_v19 = vld [vmem:[%s1452_s25 + $0x22] sm:$0xff]  ;;  %v1548_v21 = vld [vmem:[%s1452_s25 + $0x52] sm:$0xff]  ;;  %v1551_v22 = vld [vmem:[%s1452_s25 + $0x4a] sm:$0xff] }
  0x1f   : > { %2120 = vst [vmem:[#allocation5_spill] sm:$0xff] %v1536_v19  ;;  %v1554_v23 = vld [vmem:[%s1452_s25 + $0x3a] sm:$0xff]  ;;  %v1566_v25 = vld [vmem:[%s1452_s25 + $0x6a] sm:$0xff]  ;;  %v1569_v26 = vld [vmem:[%s1452_s25 + $0x62] sm:$0xff] }
  0x20   : > { %377 = vrot.lane.b32.xlu2 %v1467_v3, %s1384_s26  ;;  %373 = vrot.lane.b32.xlu1 %v1470_v4, %s1384_s26  ;;  %v1563_v24 = vld [vmem:[%s1452_s25 + $0x7a] sm:$0xff]  ;;  %v1581_v28 = vld [vmem:[%s1452_s25 + $0x92] sm:$0xff] }
  0x21   : > { %369 = vrot.lane.b32.xlu0 %v222_v5, %s1384_s26  ;;  %v1578_v27 = vld [vmem:[%s1452_s25 + $0x9a] sm:$0xff]  ;;  %v1584_v29 = vld [vmem:[%s1452_s25 + $0x82] sm:$0xff]  ;;  %v1594_v31 = vld [vmem:[%s1452_s25 + $0xb2] sm:$0xff] }
  0x22   : > { %v1176_v30 = vld [vmem:[%s1452_s25 + $0x18] sm:$0xff]  ;;  %v1597_v32 = vld [vmem:[%s1452_s25 + $0xaa] sm:$0xff]  ;;  %v1177_v35 = vld [vmem:[%s1452_s25 + $0x20] sm:$0xff] }
  0x23   : > { %v1605_v33 = vld [vmem:[%s1452_s25 + $0x38] sm:$0xff]  ;;  %v1608_v34 = vld [vmem:[%s1452_s25 + $0x30] sm:$0xff]  ;;  %v1617_v37 = vld [vmem:[%s1452_s25 + $0x60] sm:$0xff] }
  0x24   : > { %2122 = vst [vmem:[#allocation7_spill] sm:$0xff] %v1608_v34  ;;  %v1620_v38 = vld [vmem:[%s1452_s25 + $0x50] sm:$0xff]  ;;  %v1623_v39 = vld [vmem:[%s1452_s25 + $0x48] sm:$0xff]  ;;  %v1634_v41 = vld [vmem:[%s1452_s25 + $0x80] sm:$0xff] }
  0x25   : > { %v1637_v42 = vld [vmem:[%s1452_s25 + $0x78] sm:$0xff]  ;;  %v1640_v43 = vld [vmem:[%s1452_s25 + $0x68] sm:$0xff]  ;;  %v1657_v47 = vld [vmem:[%s1452_s25 + $0x90] sm:$0xff] }
  0x26   : > { %v1651_v45 = vld [vmem:[%s1452_s25 + $0xa8] sm:$0xff]  ;;  %v1654_v46 = vld [vmem:[%s1452_s25 + $0x98] sm:$0xff]  ;;  %v1674_v53 = vld [vmem:[%s1452_s25 + $0xc0] sm:$0xff] }
  0x27   : > { %v1671_v52 = vld [vmem:[%s1452_s25 + $0xc8] sm:$0xff]  ;;  %v1677_v54 = vld [vmem:[%s1452_s25 + $0xb0] sm:$0xff] }
  0x28   : > { %383 = vrot.lane.b32.xlu2 %v1479_v6, %s1384_s26  ;;  %381 = vrot.lane.b32.xlu1 %v1482_v7, %s1384_s26  ;;  %v206_v59 = vld [vmem:[%s1452_s25 + $0x8] sm:$0xff] }
  0x29   : > { %379 = vrot.lane.b32.xlu0 %v1485_v8, %s1384_s26  ;;  %v1700_v5 = vld [vmem:[%s1452_s25 + $0xca] sm:$0xff] }
  0x30   : > { %389 = vrot.lane.b32.xlu2 %v1494_v9, %s1384_s26  ;;  %387 = vrot.lane.b32.xlu1 %v1497_v10, %s1384_s26 }
  0x31   : > { %385 = vrot.lane.b32.xlu0 %v1500_v11, %s1384_s26 }
  0x38   : > { %395 = vrot.lane.b32.xlu2 %v1509_v12, %s1384_s26  ;;  %393 = vrot.lane.b32.xlu1 %v1512_v13, %s1384_s26 }
  0x39   : > { %391 = vrot.lane.b32.xlu0 %v1515_v14, %s1384_s26 }
  0x40   : > { %433 = vrot.lane.b32.xlu2 %v238_v15, %s1385_s27  ;;  %431 = vrot.lane.b32.xlu1 %v237_v16, %s1385_s27  ;;  %v1207_v15 = vld [vmem:[%s1452_s25 + $0xc9] sm:$0xff] }
  0x41   : > { %397 = vrot.lane.b32.xlu0 %v1526_v17, %s1384_s26 }
  0x48   : > { %439 = vrot.lane.b32.xlu2 %v1533_v18, %s1385_s27  ;;  %437 = vrot.lane.b32.xlu1 %v1536_v19, %s1385_s27  ;;  %v1270_v18 = vld [vmem:[%s1452_s25 + $0xda] sm:$0xff] }
  0x49   : > { %435 = vrot.lane.b32.xlu0 %v1539_v20, %s1385_s27  ;;  %v205_v20 = vld [vmem:[%s1452_s25] sm:$0xff] }
  0x50   : > { %445 = vrot.lane.b32.xlu2 %v1548_v21, %s1385_s27  ;;  %443 = vrot.lane.b32.xlu1 %v1551_v22, %s1385_s27 }
  0x51   : > { %441 = vrot.lane.b32.xlu0 %v1554_v23, %s1385_s27 }
  0x58   : > { %451 = vrot.lane.b32.xlu2 %v1563_v24, %s1385_s27  ;;  %449 = vrot.lane.b32.xlu1 %v1566_v25, %s1385_s27 }
  0x59   : > { %447 = vrot.lane.b32.xlu0 %v1569_v26, %s1385_s27 }
  0x60   : > { %457 = vrot.lane.b32.xlu2 %v1578_v27, %s1385_s27  ;;  %455 = vrot.lane.b32.xlu1 %v1581_v28, %s1385_s27 }
  0x61   : > { %453 = vrot.lane.b32.xlu0 %v1584_v29, %s1385_s27 }
  0x68   : > { %495 = vrot.lane.b32.xlu2 %v1176_v30, %s1386_s28  ;;  %461 = vrot.lane.b32.xlu1 %v1594_v31, %s1385_s27 }
  0x69   : > { %459 = vrot.lane.b32.xlu0 %v1597_v32, %s1385_s27 }
  0x70   : > { %501 = vrot.lane.b32.xlu2 %v1605_v33, %s1386_s28  ;;  %499 = vrot.lane.b32.xlu1 %v1608_v34, %s1386_s28 }
  0x71   : > { %497 = vrot.lane.b32.xlu0 %v1177_v35, %s1386_s28 }
  0x72   : > { %v376_v36 = vpop.permute.xlu2 %375 }
  0x78   : > { %507 = vrot.lane.b32.xlu2 %v1617_v37, %s1386_s28  ;;  %505 = vrot.lane.b32.xlu1 %v1620_v38, %s1386_s28 }
  0x79   : > { %503 = vrot.lane.b32.xlu0 %v1623_v39, %s1386_s28 }
  0x7a   : > { %v1631_v40 = vpop.permute.xlu2 %377 }
  0x80   : > { %513 = vrot.lane.b32.xlu2 %v1634_v41, %s1386_s28  ;;  %511 = vrot.lane.b32.xlu1 %v1637_v42, %s1386_s28 }
  0x81   : > { %509 = vrot.lane.b32.xlu0 %v1640_v43, %s1386_s28 }
  0x82   : > { %v1648_v44 = vpop.permute.xlu2 %383 }
  0x88   : > { %519 = vrot.lane.b32.xlu2 %v1651_v45, %s1386_s28  ;;  %517 = vrot.lane.b32.xlu1 %v1654_v46, %s1386_s28 }
  0x89   : > { %515 = vrot.lane.b32.xlu0 %v1657_v47, %s1386_s28 }
  0x8a   : > { %v1665_v48 = vpop.permute.xlu2 %389  ;;  %v372_v49 = vpop.permute.xlu1 %371 }
  0x8b   : > { %v1668_v50 = vsel %vm863_vm0, %v1176_v30, %v372_v49  ;;  %v368_v51 = vpop.permute.xlu0 %367  ;;  %v1714_v49 = vld [vmem:[%s1452_s25 + $0xc1] sm:$0xff] }
  0x90   : > { %525 = vrot.lane.b32.xlu2 %v1671_v52, %s1386_s28  ;;  %523 = vrot.lane.b32.xlu1 %v1674_v53, %s1386_s28 }
  0x91   : > { %521 = vrot.lane.b32.xlu0 %v1677_v54, %s1386_s28 }
  0x92   : > { %v1685_v55 = vpop.permute.xlu2 %395  ;;  %v374_v56 = vpop.permute.xlu1 %373 }
  0x93   : > { %v867_v57 = vsel %vm863_vm0, %v1177_v35, %v374_v56  ;;  %v370_v58 = vpop.permute.xlu0 %369  ;;  %v1255_v56 = vld [vmem:[%s1452_s25 + $0xe1] sm:$0xff] }
  0x94   : > { %v865_v60 = vsel %vm863_vm0, %v206_v59, %v370_v58  ;;  %v1239_v58 = vld [vmem:[%s1452_s25 + $0xe0] sm:$0xff] }
  0x98   : > { %563 = vrot.lane.b32.xlu2 %v1455_v0, %s1387_s29  ;;  %561 = vrot.lane.b32.xlu1 %v1470_v4, %s1387_s29  ;;  %v1222_v0 = vld [vmem:[%s1452_s25 + $0xc2] sm:$0xff] }
  0x99   : > { %559 = vrot.lane.b32.xlu0 %v1458_v1, %s1387_s29  ;;  %v868_v1 = vsel %vm863_vm0, %v1608_v34, %v376_v36  ;;  %v1271_v34 = vld [vmem:[%s1452_s25 + $0xe2] sm:$0xff] }
  0x9a   : > { %v434_v61 = vpop.permute.xlu2 %433  ;;  %v382_v62 = vpop.permute.xlu1 %381 }
  0x9b   : > { %v1697_v63 = vsel %vm880_vm1, %v865_v60, %v434_v61  ;;  %v380_v2 = vpop.permute.xlu0 %379  ;;  %v871_v36 = vsel %vm863_vm0, %v1620_v38, %v382_v62  ;;  %v864_v62 = vsel %vm863_vm0, %v205_v20, %v368_v51 }
  0xa0   : > { %653 = vrot.lane.b32.xlu2 %v1700_v5, %s1388_s30  ;;  %589 = vrot.lane.b32.xlu1 %v1207_v15, %s1387_s29 }
  0xa1   : > { %565 = vrot.lane.b32.xlu0 %v1467_v3, %s1387_s29 }
  0xa2   : > { %v440_v4 = vpop.permute.xlu2 %439  ;;  %v388_v16 = vpop.permute.xlu1 %387 }
  0xa3   : > { %v1711_v30 = vsel %vm880_vm1, %v868_v1, %v440_v4  ;;  %v386_v35 = vpop.permute.xlu0 %385  ;;  %v1238_v4 = vld [vmem:[%s1452_s25 + $0xd8] sm:$0xff] }
  0xa8   : > { %587 = vrot.lane.b32.xlu2 %v1714_v49, %s1387_s29  ;;  %781 = vrot.lane.b32.xlu1 %v1255_v56, %s1389_s4  ;;  %v874_v56 = vsel %vm863_vm0, %v1637_v42, %v388_v16 }
  0xa9   : > { %717 = vrot.lane.b32.xlu0 %v1239_v58, %s1390_s5 }
  0xaa   : > { %v446_v59 = vpop.permute.xlu2 %445  ;;  %v394_v60 = vpop.permute.xlu1 %393 }
  0xab   : > { %v1725_v61 = vsel %vm880_vm1, %v871_v36, %v446_v59  ;;  %v392_v1 = vpop.permute.xlu0 %391  ;;  %v877_v20 = vsel %vm863_vm0, %v1654_v46, %v394_v60 }
  0xb0   : > { %715 = vrot.lane.b32.xlu2 %v1238_v4, %s1390_s5  ;;  %651 = vrot.lane.b32.xlu1 %v1222_v0, %s1388_s30  ;;  %v1254_v4 = vld [vmem:[%s1452_s25 + $0xd9] sm:$0xff] }
  0xb1   : > { %845 = vrot.lane.b32.xlu0 %v1271_v34, %s1391_s6 }
  0xb2   : > { %v452_v58 = vpop.permute.xlu2 %451  ;;  %v432_v36 = vpop.permute.xlu1 %431 }
  0xb3   : > { %v1738_v59 = vsel %vm880_vm1, %v874_v56, %v452_v58  ;;  %v881_v19 = vsel %vm880_vm1, %v864_v62, %v432_v36  ;;  %v398_v3 = vpop.permute.xlu0 %397 }
  0xb8   : > { %843 = vrot.lane.b32.xlu2 %v1270_v18, %s1391_s6  ;;  %585 = vrot.lane.b32.xlu1 %v1526_v17, %s1387_s29  ;;  %v870_v18 = vsel %vm863_vm0, %v1623_v39, %v380_v2 }
  0xb9   : > { %779 = vrot.lane.b32.xlu0 %v1254_v4, %s1389_s4 }
  0xba   : > { %v458_v34 = vpop.permute.xlu2 %457  ;;  %v438_v51 = vpop.permute.xlu1 %437 }
  0xbb   : > { %v1750_v16 = vsel %vm880_vm1, %v877_v20, %v458_v34  ;;  %v884_v62 = vsel %vm880_vm1, %v867_v57, %v438_v51  ;;  %v436_v56 = vpop.permute.xlu0 %435  ;;  %v869_v57 = vsel %vm863_vm0, %v1605_v33, %v1631_v40  ;;  %v873_v40 = vsel %vm863_vm0, %v1640_v43, %v386_v35 }
  0xbc   : > { %v883_v58 = vsel %vm880_vm1, %v1668_v50, %v436_v56  ;;  %v872_v20 = vsel %vm863_vm0, %v1617_v37, %v1648_v44  ;;  %v876_v44 = vsel %vm863_vm0, %v1657_v47, %v392_v1 }
  0xc0   : > { %777 = vrot.lane.b32.xlu2 %v1207_v15, %s1389_s4  ;;  %713 = vrot.lane.b32.xlu1 %v1671_v52, %s1390_s5 }
  0xc1   : > { %649 = vrot.lane.b32.xlu0 %v1594_v31, %s1388_s30 }
  0xc2   : > { %v496_v60 = vpop.permute.xlu2 %495  ;;  %v444_v36 = vpop.permute.xlu1 %443 }
  0xc3   : > { %v1766_v50 = vsel %vm897_vm2, %v881_v19, %v496_v60  ;;  %v887_v15 = vsel %vm880_vm1, %v870_v18, %v444_v36  ;;  %v442_v4 = vpop.permute.xlu0 %441  ;;  %v875_v18 = vsel %vm863_vm0, %v1634_v41, %v1665_v48 }
  0xc4   : > { %v886_v52 = vsel %vm880_vm1, %v869_v57, %v442_v4 }
  0xc8   : > { %647 = vrot.lane.b32.xlu2 %v1597_v32, %s1388_s30  ;;  %841 = vrot.lane.b32.xlu1 %v1700_v5, %s1391_s6 }
  0xc9   : > { %583 = vrot.lane.b32.xlu0 %v1509_v12, %s1387_s29 }
  0xca   : > { %v502_v2 = vpop.permute.xlu2 %501  ;;  %v450_v19 = vpop.permute.xlu1 %449 }
  0xcb   : > { %v1782_v34 = vsel %vm897_vm2, %v884_v62, %v502_v2  ;;  %v890_v51 = vsel %vm880_vm1, %v873_v40, %v450_v19  ;;  %v448_v56 = vpop.permute.xlu0 %447 }
  0xcc   : > { %v889_v5 = vsel %vm880_vm1, %v872_v20, %v448_v56 }
  0xd0   : > { %581 = vrot.lane.b32.xlu2 %v1512_v13, %s1387_s29  ;;  %775 = vrot.lane.b32.xlu1 %v1714_v49, %s1389_s4 }
  0xd1   : > { %711 = vrot.lane.b32.xlu0 %v1674_v53, %s1390_s5  ;;  %v879_v53 = vsel %vm863_vm0, %v1677_v54, %v398_v3 }
  0xd2   : > { %v508_v35 = vpop.permute.xlu2 %507  ;;  %v456_v62 = vpop.permute.xlu1 %455 }
  0xd3   : > { %v1798_v60 = vsel %vm897_vm2, %v887_v15, %v508_v35  ;;  %v893_v36 = vsel %vm880_vm1, %v876_v44, %v456_v62  ;;  %v454_v57 = vpop.permute.xlu0 %453  ;;  %v878_v15 = vsel %vm863_vm0, %v1651_v45, %v1685_v55 }
  0xd4   : > { %v892_v49 = vsel %vm880_vm1, %v875_v18, %v454_v57 }
  0xd8   : > { %709 = vrot.lane.b32.xlu2 %v1677_v54, %s1390_s5  ;;  %645 = vrot.lane.b32.xlu1 %v1578_v27, %s1388_s30 }
  0xd9   : > { %839 = vrot.lane.b32.xlu0 %v1222_v0, %s1391_s6 }
  0xda   : > { %v514_v48 = vpop.permute.xlu2 %513  ;;  %v462_v1 = vpop.permute.xlu1 %461 }
  0xdb   : > { %v1813_v4 = vsel %vm897_vm2, %v890_v51, %v514_v48  ;;  %v1816_v40 = vsel %vm880_vm1, %v879_v53, %v462_v1  ;;  %v460_v2 = vpop.permute.xlu0 %459 }
  0xdc   : > { %v1819_v19 = vsel %vm880_vm1, %v878_v15, %v460_v2 }
  0xe0   : > { %837 = vrot.lane.b32.xlu2 %v1594_v31, %s1391_s6  ;;  %579 = vrot.lane.b32.xlu1 %v1515_v14, %s1387_s29 }
  0xe1   : > { %773 = vrot.lane.b32.xlu0 %v1526_v17, %s1389_s4 }
  0xe2   : > { %v520_v0 = vpop.permute.xlu2 %519  ;;  %v500_v3 = vpop.permute.xlu1 %499 }
  0xe3   : > { %v1828_v54 = vsel %vm897_vm2, %v893_v36, %v520_v0  ;;  %v900_v55 = vsel %vm897_vm2, %v883_v58, %v500_v3  ;;  %v498_v20 = vpop.permute.xlu0 %497 }
  0xe4   : > { %v899_v51 = vsel %vm897_vm2, %v1697_v63, %v498_v20 }
  0xe8   : > { %771 = vrot.lane.b32.xlu2 %v1509_v12, %s1389_s4  ;;  %707 = vrot.lane.b32.xlu1 %v1651_v45, %s1390_s5 }
  0xe9   : > { %643 = vrot.lane.b32.xlu0 %v1581_v28, %s1388_s30 }
  0xea   : > { %v526_v17 = vpop.permute.xlu2 %525  ;;  %v506_v31 = vpop.permute.xlu1 %505 }
  0xeb   : > { %v1840_v56 = vsel %vm897_vm2, %v886_v52, %v506_v31  ;;  %v504_v44 = vpop.permute.xlu0 %503 }
  0xec   : > { %v1844_v58 = vsel %vm897_vm2, %v1711_v30, %v504_v44 }
  0xf0   : > { %641 = vrot.lane.b32.xlu2 %v1584_v29, %s1388_s30  ;;  %835 = vrot.lane.b32.xlu1 %v1597_v32, %s1391_s6 }
  0xf1   : > { %577 = vrot.lane.b32.xlu0 %v1494_v9, %s1387_s29 }
  0xf2   : > { %v564_v12 = vpop.permute.xlu2 %563  ;;  %v512_v45 = vpop.permute.xlu1 %511 }
  0xf3   : > { %v1853_v63 = vsel %vm914_vm3, %v900_v55, %v564_v12  ;;  %v1856_v52 = vsel %vm897_vm2, %v889_v5, %v512_v45  ;;  %v510_v30 = vpop.permute.xlu0 %509 }
  0xf4   : > { %v1860_v35 = vsel %vm897_vm2, %v1725_v61, %v510_v30 }
  0xf8   : > { %575 = vrot.lane.b32.xlu2 %v1497_v10, %s1387_s29  ;;  %769 = vrot.lane.b32.xlu1 %v1512_v13, %s1389_s4 }
  0xf9   : > { %705 = vrot.lane.b32.xlu0 %v1654_v46, %s1390_s5 }
  0xfa   : > { %v654_v32 = vpop.permute.xlu2 %653  ;;  %v518_v62 = vpop.permute.xlu1 %517 }
  0xfb   : > { %v1869_v18 = vsel %vm897_vm2, %v892_v49, %v518_v62  ;;  %v516_v5 = vpop.permute.xlu0 %515 }
  0xfc   : > { %v1873_v36 = vsel %vm897_vm2, %v1738_v59, %v516_v5 }
 0x100   : > { %703 = vrot.lane.b32.xlu2 %v1657_v47, %s1390_s5  ;;  %639 = vrot.lane.b32.xlu1 %v1563_v24, %s1388_s30 }
 0x101   : > { %833 = vrot.lane.b32.xlu0 %v1578_v27, %s1391_s6 }
 0x102   : > { %v588_v13 = vpop.permute.xlu2 %587  ;;  %v524_v46 = vpop.permute.xlu1 %523 }
 0x103   : > { %v522_v61 = vpop.permute.xlu0 %521  ;;  %v912_v55 = vsel %vm897_vm2, %v1819_v19, %v524_v46 }
 0x108   : > { %831 = vrot.lane.b32.xlu2 %v1581_v28, %s1391_s6  ;;  %573 = vrot.lane.b32.xlu1 %v1500_v11, %s1387_s29 }
 0x109   : > { %767 = vrot.lane.b32.xlu0 %v1515_v14, %s1389_s4 }
 0x10a   : > { %v716_v59 = vpop.permute.xlu2 %715  ;;  %v562_v47 = vpop.permute.xlu1 %561 }
 0x10b   : > { %v1888_v57 = vsel %vm914_vm3, %v899_v51, %v562_v47  ;;  %v560_v49 = vpop.permute.xlu0 %559 }
 0x10c   : > { %v1892_v27 = vsel %vm914_vm3, %v1766_v50, %v560_v49  ;;  %v913_v50 = vsel %vm897_vm2, %v1816_v40, %v526_v17 }
 0x110   : > { %765 = vrot.lane.b32.xlu2 %v1494_v9, %s1389_s4  ;;  %701 = vrot.lane.b32.xlu1 %v1634_v41, %s1390_s5 }
 0x111   : > { %637 = vrot.lane.b32.xlu0 %v1566_v25, %s1388_s30 }
 0x112   : > { %v844_v14 = vpop.permute.xlu2 %843  ;;  %v590_v28 = vpop.permute.xlu1 %589 }
 0x113   : > { %v566_v53 = vpop.permute.xlu0 %565  ;;  %v930_v15 = vsel %vm914_vm3, %v913_v50, %v590_v28 }
 0x114   : > { %v1902_v48 = vsel %vm914_vm3, %v1782_v34, %v566_v53  ;;  %v947_v34 = vsel %vm931_vm4, %v930_v15, %v654_v32 }
 0x118   : > { %635 = vrot.lane.b32.xlu2 %v1569_v26, %s1388_s30  ;;  %829 = vrot.lane.b32.xlu1 %v1584_v29, %s1391_s6 }
 0x119   : > { %571 = vrot.lane.b32.xlu0 %v1479_v6, %s1387_s29 }
 0x11a   : > { %v778_v9 = vpop.permute.xlu2 %777  ;;  %v782_v41 = vpop.permute.xlu1 %781 }
 0x11b   : > { %v718_v1 = vpop.permute.xlu0 %717 }
 0x11c   : > { %v964_v2 = vsel %vm948_vm5, %v947_v34, %v718_v1 }
 0x11d   : > { %v981_v3 = vsel %vm965_vm6, %v964_v2, %v782_v41 }
 0x120   : > { %569 = vrot.lane.b32.xlu2 %v1482_v7, %s1387_s29  ;;  %763 = vrot.lane.b32.xlu1 %v1497_v10, %s1389_s4  ;;  %v929_v10 = vsel %vm914_vm3, %v912_v55, %v588_v13 }
 0x121   : > { %699 = vrot.lane.b32.xlu0 %v1637_v42, %s1390_s5 }
 0x122   : > { %v648_v29 = vpop.permute.xlu2 %647  ;;  %v652_v40 = vpop.permute.xlu1 %651 }
 0x123   : > { %v846_v0 = vpop.permute.xlu0 %845  ;;  %v946_v51 = vsel %vm931_vm4, %v929_v10, %v652_v40 }
 0x124   : > { %v998_v20 = vsel %vm982_vm7, %v981_v3, %v846_v0  ;;  %v963_v31 = vsel %vm948_vm5, %v946_v51, %v716_v59  ;;  %v2126_v0 = vld [vmem:[#allocation6_spill] sm:$0xff] }
 0x125   : > { %1272 = vmatpush.xpose.msk.msra.mxu0 %vm1006_vm8, %v998_v20  ;;  %v2128_v51 = vld [vmem:[#allocation2_spill] sm:$0xff] }
 0x128   : > { %697 = vrot.lane.b32.xlu2 %v1640_v43, %s1390_s5  ;;  %633 = vrot.lane.b32.xlu1 %v1548_v21, %s1388_s30 }
 0x129   : > { %827 = vrot.lane.b32.xlu0 %v1563_v24, %s1391_s6  ;;  %v911_v24 = vsel %vm897_vm2, %v1750_v16, %v522_v61 }
 0x12a   : > { %v582_v42 = vpop.permute.xlu2 %581  ;;  %v586_v17 = vpop.permute.xlu1 %585 }
 0x12b   : > { %v780_v19 = vpop.permute.xlu0 %779  ;;  %v928_v30 = vsel %vm914_vm3, %v911_v24, %v586_v17 }
 0x12c   : > { %v980_v44 = vsel %vm965_vm6, %v963_v31, %v780_v19 }
 0x12d   : > { %v997_v12 = vsel %vm982_vm7, %v980_v44, %v844_v14  ;;  %v2123_v14 = vld [vmem:[#allocation4_spill] sm:$0xff] }
 0x12e   : > { %1273 = vmatpush.xpose.msk.msra.mxu0 %vm1006_vm8, %v997_v12 }
 0x130   : > { %825 = vrot.lane.b32.xlu2 %v1566_v25, %s1391_s6  ;;  %567 = vrot.lane.b32.xlu1 %v1485_v8, %s1387_s29 }
 0x131   : > { %761 = vrot.lane.b32.xlu0 %v1500_v11, %s1389_s4 }
 0x132   : > { %v710_v43 = vpop.permute.xlu2 %709  ;;  %v714_v45 = vpop.permute.xlu1 %713 }
 0x133   : > { %v650_v32 = vpop.permute.xlu0 %649 }
 0x134   : > { %v945_v62 = vsel %vm931_vm4, %v928_v30, %v650_v32 }
 0x135   : > { %v962_v5 = vsel %vm948_vm5, %v945_v62, %v714_v45 }
 0x136   : > { %v979_v16 = vsel %vm965_vm6, %v962_v5, %v778_v9  ;;  %v926_v9 = vsel %vm914_vm3, %v1869_v18, %v582_v42 }
 0x138   : > { %759 = vrot.lane.b32.xlu2 %v1479_v6, %s1389_s4  ;;  %695 = vrot.lane.b32.xlu1 %v1617_v37, %s1390_s5 }
 0x139   : > { %631 = vrot.lane.b32.xlu0 %v1551_v22, %s1388_s30 }
 0x13a   : > { %v838_v11 = vpop.permute.xlu2 %837  ;;  %v842_v25 = vpop.permute.xlu1 %841 }
 0x13b   : > { %v584_v13 = vpop.permute.xlu0 %583  ;;  %v996_v46 = vsel %vm982_vm7, %v979_v16, %v842_v25 }
 0x13c   : > { %1274 = vmatpush.xpose.msk.msra.mxu0 %vm1006_vm8, %v996_v46  ;;  %v927_v59 = vsel %vm914_vm3, %v1828_v54, %v584_v13 }
 0x13d   : > { %v944_v47 = vsel %vm931_vm4, %v927_v59, %v648_v29 }
 0x140   : > { %693 = vrot.lane.b32.xlu2 %v1620_v38, %s1390_s5  ;;  %629 = vrot.lane.b32.xlu1 %v1554_v23, %s1388_s30 }
 0x141   : > { %823 = vrot.lane.b32.xlu0 %v1569_v26, %s1391_s6 }
 0x142   : > { %v776_v6 = vpop.permute.xlu1 %775  ;;  %v772_v37 = vpop.permute.xlu2 %771 }
 0x143   : > { %v712_v61 = vpop.permute.xlu0 %711 }
 0x144   : > { %v961_v49 = vsel %vm948_vm5, %v944_v47, %v712_v61 }
 0x145   : > { %v978_v28 = vsel %vm965_vm6, %v961_v49, %v776_v6 }
 0x148   : > { %627 = vrot.lane.b32.xlu2 %v2123_v14, %s1388_s30  ;;  %821 = vrot.lane.b32.xlu1 %v1548_v21, %s1391_s6 }
 0x149   : > { %757 = vrot.lane.b32.xlu0 %v1482_v7, %s1389_s4 }
 0x14a   : > { %v646_v26 = vpop.permute.xlu1 %645  ;;  %v642_v54 = vpop.permute.xlu2 %641 }
 0x14b   : > { %v840_v38 = vpop.permute.xlu0 %839  ;;  %v943_v41 = vsel %vm931_vm4, %v926_v9, %v646_v26 }
 0x14c   : > { %v995_v53 = vsel %vm982_vm7, %v978_v28, %v840_v38  ;;  %v960_v50 = vsel %vm948_vm5, %v943_v41, %v710_v43 }
 0x14d   : > { %1275 = vmatpush.xpose.msk.msra.mxu0 %vm1006_vm8, %v995_v53 }
 0x150   : > { %755 = vrot.lane.b32.xlu1 %v1485_v8, %s1389_s4  ;;  %819 = vrot.lane.b32.xlu2 %v1551_v22, %s1391_s6  ;;  %v2124_v8 = vld [vmem:[#allocation3_spill] sm:$0xff]  ;;  %v2125_v22 = vld [vmem:[#allocation5_spill] sm:$0xff] }
 0x151   : > { %691 = vrot.lane.b32.xlu0 %v1623_v39, %s1390_s5 }
 0x152   : > { %v580_v7 = vpop.permute.xlu1 %579  ;;  %v576_v18 = vpop.permute.xlu2 %575 }
 0x153   : > { %v774_v21 = vpop.permute.xlu0 %773  ;;  %v925_v34 = vsel %vm914_vm3, %v1873_v36, %v580_v7  ;;  %v923_v32 = vsel %vm914_vm3, %v1856_v52, %v576_v18 }
 0x154   : > { %v977_v1 = vsel %vm965_vm6, %v960_v50, %v774_v21 }
 0x155   : > { %v994_v15 = vsel %vm982_vm7, %v977_v1, %v838_v11 }
 0x156   : > { %1276 = vmatpush.xpose.msk.msra.mxu0 %vm1006_vm8, %v994_v15 }
 0x158   : > { %689 = vrot.lane.b32.xlu1 %v1605_v33, %s1390_s5  ;;  %753 = vrot.lane.b32.xlu2 %v2124_v8, %s1389_s4  ;;  %v2127_v33 = vld [vmem:[#allocation7_spill] sm:$0xff] }
 0x159   : > { %625 = vrot.lane.b32.xlu0 %v2125_v22, %s1388_s30 }
 0x15a   : > { %v708_v39 = vpop.permute.xlu1 %707  ;;  %v704_v3 = vpop.permute.xlu2 %703 }
 0x15b   : > { %v644_v2 = vpop.permute.xlu0 %643 }
 0x15c   : > { %v942_v29 = vsel %vm931_vm4, %v925_v34, %v644_v2 }
 0x15d   : > { %v959_v40 = vsel %vm948_vm5, %v942_v29, %v708_v39 }
 0x15e   : > { %v976_v20 = vsel %vm965_vm6, %v959_v40, %v772_v37 }
 0x160   : > { %623 = vrot.lane.b32.xlu1 %v2126_v0, %s1388_s30  ;;  %687 = vrot.lane.b32.xlu2 %v2127_v33, %s1390_s5 }
 0x161   : > { %817 = vrot.lane.b32.xlu0 %v1554_v23, %s1391_s6 }
 0x162   : > { %v836_v55 = vpop.permute.xlu1 %835  ;;  %v832_v17 = vpop.permute.xlu2 %831 }
 0x163   : > { %v578_v10 = vpop.permute.xlu0 %577  ;;  %v993_v36 = vsel %vm982_vm7, %v976_v20, %v836_v55 }
 0x164   : > { %1277 = vmatpush.xpose.msk.msra.mxu0 %vm1006_vm8, %v993_v36  ;;  %v924_v23 = vsel %vm914_vm3, %v1813_v4, %v578_v10 }
 0x165   : > { %v941_v31 = vsel %vm931_vm4, %v924_v23, %v642_v54 }
 0x168   : > { %815 = vrot.lane.b32.xlu1 %v2123_v14, %s1391_s6 }
 0x169   : > { %751 = vrot.lane.b32.xlu0 %v2128_v51, %s1389_s4 }
 0x16a   : > { %v770_v42 = vpop.permute.xlu1 %769  ;;  %v766_v30 = vpop.permute.xlu2 %765 }
 0x16b   : > { %v706_v19 = vpop.permute.xlu0 %705 }
 0x16c   : > { %v958_v44 = vsel %vm948_vm5, %v941_v31, %v706_v19 }
 0x16d   : > { %v975_v43 = vsel %vm965_vm6, %v958_v44, %v770_v42  ;;  %v1000_v44 = vld [vmem:[%s2108_s2] sm:$0xff] }
 0x172   : > { %v640_v12 = vpop.permute.xlu1 %639  ;;  %v636_v13 = vpop.permute.xlu2 %635 }
 0x173   : > { %v834_v24 = vpop.permute.xlu0 %833  ;;  %v940_v62 = vsel %vm931_vm4, %v923_v32, %v640_v12 }
 0x174   : > { %v992_v45 = vsel %vm982_vm7, %v975_v43, %v834_v24  ;;  %v957_v11 = vsel %vm948_vm5, %v940_v62, %v704_v3  ;;  %v1392_v24 = vmov 0  }
 0x175   : > { %1278 = vmatpush.xpose.msk.msra.mxu0 %vm1006_vm8, %v992_v45  ;;  %1342 = vset.pattern.permute.xlu2 %v1392_v24 }
 0x176   : > { %1343 = vset.pattern.permute.xlu0 %v1392_v24  ;;  %1003 = vperm.xlu2 %1342, %v1000_v44  }
 0x17a   : > { %v574_v5 = vpop.permute.xlu1 %573  ;;  %v570_v59 = vpop.permute.xlu2 %569 }
 0x17b   : > { %v768_v4 = vpop.permute.xlu0 %767  ;;  %v922_v6 = vsel %vm914_vm3, %v1860_v35, %v574_v5  ;;  %v920_v15 = vsel %vm914_vm3, %v1840_v56, %v570_v59 }
 0x17c   : > { %v974_v25 = vsel %vm965_vm6, %v957_v11, %v768_v4 }
 0x17d   : > { %v991_v16 = vsel %vm982_vm7, %v974_v25, %v832_v17 }
 0x17e   : > { %1279 = vmatpush.xpose.msk.msra.mxu0 %vm1006_vm8, %v991_v16 }
 0x182   : > { %v702_v46 = vpop.permute.xlu1 %701  ;;  %v698_v28 = vpop.permute.xlu2 %697 }
 0x183   : > { %v638_v37 = vpop.permute.xlu0 %637 }
 0x184   : > { %v939_v52 = vsel %vm931_vm4, %v922_v6, %v638_v37 }
 0x185   : > { %v956_v61 = vsel %vm948_vm5, %v939_v52, %v702_v46 }
 0x186   : > { %v973_v49 = vsel %vm965_vm6, %v956_v61, %v766_v30 }
 0x18a   : > { %v830_v47 = vpop.permute.xlu1 %829  ;;  %v826_v1 = vpop.permute.xlu2 %825 }
 0x18b   : > { %v572_v14 = vpop.permute.xlu0 %571  ;;  %v990_v26 = vsel %vm982_vm7, %v973_v49, %v830_v47 }
 0x18c   : > { %1280 = vmatpush.xpose.msk.msra.mxu0 %vm1006_vm8, %v990_v26  ;;  %v921_v35 = vsel %vm914_vm3, %v1798_v60, %v572_v14  ;;  %v999_v14 = vld [vmem:[%s2107_s1] sm:$0xff] }
 0x18d   : > { %v938_v54 = vsel %vm931_vm4, %v921_v35, %v636_v13 }
 0x192   : > { %v764_v38 = vpop.permute.xlu1 %763  ;;  %v760_v2 = vpop.permute.xlu2 %759 }
 0x193   : > { %v700_v53 = vpop.permute.xlu0 %699 }
 0x194   : > { %v955_v9 = vsel %vm948_vm5, %v938_v54, %v700_v53 }
 0x195   : > { %v972_v21 = vsel %vm965_vm6, %v955_v9, %v764_v38 }
 0x19a   : > { %v634_v41 = vpop.permute.xlu1 %633  ;;  %v694_v3 = vpop.permute.xlu2 %693 }
 0x19b   : > { %v828_v7 = vpop.permute.xlu0 %827  ;;  %v937_v18 = vsel %vm931_vm4, %v920_v15, %v634_v41 }
 0x19c   : > { %v989_v50 = vsel %vm982_vm7, %v972_v21, %v828_v7  ;;  %v954_v22 = vsel %vm948_vm5, %v937_v18, %v698_v28 }
 0x19d   : > { %1281 = vmatpush.xpose.msk.msra.mxu0 %vm1006_vm8, %v989_v50 }
 0x1a2   : > { %v568_v8 = vpop.permute.xlu1 %567  ;;  %v628_v17 = vpop.permute.xlu2 %627 }
 0x1a3   : > { %v762_v60 = vpop.permute.xlu0 %761  ;;  %v919_v0 = vsel %vm914_vm3, %v1844_v58, %v568_v8 }
 0x1a4   : > { %v971_v39 = vsel %vm965_vm6, %v954_v22, %v762_v60 }
 0x1a5   : > { %v988_v34 = vsel %vm982_vm7, %v971_v39, %v826_v1 }
 0x1a6   : > { %1282 = vmatpush.xpose.msk.msra.mxu0 %vm1006_vm8, %v988_v34 }
 0x1aa   : > { %v696_v29 = vpop.permute.xlu1 %695  ;;  %v820_v45 = vpop.permute.xlu2 %819 }
 0x1ab   : > { %v632_v40 = vpop.permute.xlu0 %631 }
 0x1ac   : > { %v936_v56 = vsel %vm931_vm4, %v919_v0, %v632_v40 }
 0x1ad   : > { %v953_v33 = vsel %vm948_vm5, %v936_v56, %v696_v29 }
 0x1ae   : > { %v970_v10 = vsel %vm965_vm6, %v953_v33, %v760_v2 }
 0x1b2   : > { %v630_v55 = vpop.permute.xlu1 %629  ;;  %v754_v25 = vpop.permute.xlu2 %753 }
 0x1b3   : > { %v824_v20 = vpop.permute.xlu0 %823  ;;  %v935_v51 = vsel %vm931_vm4, %v1902_v48, %v630_v55  ;;  %v934_v48 = vsel %vm931_vm4, %v1853_v63, %v628_v17 }
 0x1b4   : > { %v987_v36 = vsel %vm982_vm7, %v970_v10, %v824_v20  ;;  %v952_v58 = vsel %vm948_vm5, %v935_v51, %v694_v3 }
 0x1b5   : > { %1283 = vmatpush.xpose.msk.msra.mxu0 %vm1006_vm8, %v987_v36 }
 0x1ba   : > { %v822_v42 = vpop.permute.xlu1 %821  ;;  %v688_v52 = vpop.permute.xlu2 %687 }
 0x1bb   : > { %v758_v19 = vpop.permute.xlu0 %757 }
 0x1bc   : > { %v969_v23 = vsel %vm965_vm6, %v952_v58, %v758_v19 }
 0x1bd   : > { %v986_v31 = vsel %vm982_vm7, %v969_v23, %v822_v42 }
 0x1be   : > { %1284 = vmatpush.xpose.msk.msra.mxu0 %vm1006_vm8, %v986_v31 }
 0x1c2   : > { %v756_v12 = vpop.permute.xlu1 %755 }
 0x1c3   : > { %v692_v43 = vpop.permute.xlu0 %691 }
 0x1c4   : > { %v951_v30 = vsel %vm948_vm5, %v934_v48, %v692_v43 }
 0x1c5   : > { %v968_v32 = vsel %vm965_vm6, %v951_v30, %v756_v12 }
 0x1c6   : > { %v985_v62 = vsel %vm982_vm7, %v968_v32, %v820_v45 }
 0x1c7   : > { %1285 = vmatpush.xpose.msk.msra.mxu0 %vm1006_vm8, %v985_v62 }
 0x1ca   : > { %v690_v5 = vpop.permute.xlu1 %689 }
 0x1cb   : > { %v626_v4 = vpop.permute.xlu0 %625 }
 0x1cc   : > { %v933_v11 = vsel %vm931_vm4, %v1888_v57, %v626_v4 }
 0x1cd   : > { %v950_v16 = vsel %vm948_vm5, %v933_v11, %v690_v5 }
 0x1ce   : > { %v967_v13 = vsel %vm965_vm6, %v950_v16, %v754_v25 }
 0x1d2   : > { %v624_v63 = vpop.permute.xlu1 %623 }
 0x1d3   : > { %v818_v46 = vpop.permute.xlu0 %817  ;;  %v932_v37 = vsel %vm931_vm4, %v1892_v27, %v624_v63  ;;  %v1004_v27 = vpop.permute.xlu2 %1003 }
 0x1d4   : > { %v984_v6 = vsel %vm982_vm7, %v967_v13, %v818_v46  ;;  %v949_v57 = vsel %vm948_vm5, %v932_v37, %v688_v52 }
 0x1d5   : > { %1286 = vmatpush.xpose.msk.msra.mxu0 %vm1006_vm8, %v984_v6 }
 0x1da   : > { %v816_v61 = vpop.permute.xlu1 %815 }
 0x1db   : > { %v752_v59 = vpop.permute.xlu0 %751 }
 0x1dc   : > { %v966_v47 = vsel %vm965_vm6, %v949_v57, %v752_v59 }
 0x1dd   : > { %v983_v49 = vsel %vm982_vm7, %v966_v47, %v816_v61 }
 0x1de   : > { %1287 = vmatpush.xpose.msk.msra.mxu0 %vm1006_vm8, %v983_v49 }
 0x1e1   : > { %1288 = vmatmul.msk.f32.vlgmr.msra.gmra.mxu0 %vm1006_vm8, %v999_v14 }
 0x25e   : > { %v1075_v26 = vpop.f32.mrf.mxu0 }
 0x25f   : > { %v1076_v38 = vadd.f32 %v1075_v26, %v1004_v27 }
 0x261   : > { %1078 = vst [vmem:[%s204_s23] sm:$0xff] %v1076_v38 }
 0x262 PF: > { %s13_s16 = sadd.s32 1, %s1382_s16   ;;  %s2129_s12 = smov %s1374_s14 }
 0x263   : > { %p10_p7 = scmp.ge.s32.totalorder %s13_s16, 6   ;;  %s2130_s13 = smov %s1378_s15 }
 0x264   : > { %s2131_s14 = smov %s2134_s17  ;;  %s2132_s15 = smov %s2138_s18 }
 0x265   :  { %12 = sbr.rel (!%p10_p7) target bundleno = 3 (0x3), region = 64 }

</bundles_post_ra>
